<compile_context>
chip_gen: v7x
topology: tpu7x:2x2x1
jax: 0.10.0
libtpu: 0.0.40
codegen_flags: <defaults>
</compile_context>

<pallas_src>
import math
import functools

import jax
import jax.numpy as jnp
from jax import lax
from jax.experimental import pallas as pl
from jax.experimental.pallas import tpu as pltpu


# Above v5e's 16 MiB scoped-VMEM default; well under every generation's physical VMEM.
_VMEM_LIMIT = 32 * 1024 * 1024


# ---------------------------------------------------------------------------
# Helpers
# ---------------------------------------------------------------------------

def _pick_tile(dim, prefs, align):
    """Largest preferred tile dividing `dim`; else the largest divisor of `dim`
    that is a multiple of `align` and <= max(prefs); else the full dim
    (a full-extent block is always layout-legal)."""
    for p in prefs:
        if p <= dim and dim % p == 0:
            return p
    cap = max(prefs)
    start = cap - (cap % align)
    for t in range(start, 0, -align):
        if dim % t == 0:
            return t
    return dim


# ---------------------------------------------------------------------------
# Tiled linear (x @ w + b) kernels
# ---------------------------------------------------------------------------

def _linear_kernel(x_ref, w_ref, b_ref, o_ref):
    # Full-K block: one MXU dot per output tile, bias fused into the store.
    o_ref[...] = (jnp.dot(x_ref[...], w_ref[...],
                          preferred_element_type=jnp.float32)
                  + b_ref[...]).astype(o_ref.dtype)


def _linear_kernel_ktiled(x_ref, w_ref, b_ref, o_ref, acc_ref):
    @pl.when(pl.program_id(2) == 0)
    def _():
        acc_ref[...] = jnp.zeros_like(acc_ref)

    acc_ref[...] += jnp.dot(x_ref[...], w_ref[...],
                            preferred_element_type=jnp.float32)

    @pl.when(pl.program_id(2) == pl.num_programs(2) - 1)
    def _():
        o_ref[...] = (acc_ref[...] + b_ref[...]).astype(o_ref.dtype)


def linear(x, w_t, b, *, out_dtype=None):
    """y = x @ w_t + b with x:[M,K], w_t:[K,N], b:[N] -> y:[M,N]."""
    M, K = x.shape
    N = w_t.shape[1]
    out_dtype = out_dtype or x.dtype

    tm = _pick_tile(M, (512, 256, 128, 64, 32, 16, 8), align=8)
    tn = _pick_tile(N, (1024, 512, 256, 128), align=128)
    b2d = b.reshape(1, N).astype(jnp.float32)

    cost = pl.CostEstimate(
        flops=2 * M * N * K,
        transcendentals=0,
        bytes_accessed=int(M * K * x.dtype.itemsize + K * N * w_t.dtype.itemsize
                           + M * N * jnp.dtype(out_dtype).itemsize),
    )

    if K <= 2048:
        # BERT-sized K: drop the K grid axis -> no acc scratch, no output revisits.
        return pl.pallas_call(
            _linear_kernel,
            out_shape=jax.ShapeDtypeStruct((M, N), out_dtype),
            grid=(M // tm, N // tn),
            in_specs=[
                pl.BlockSpec((tm, K), lambda i, j: (i, 0)),
                pl.BlockSpec((K, tn), lambda i, j: (0, j)),
                pl.BlockSpec((1, tn), lambda i, j: (0, j)),
            ],
            out_specs=pl.BlockSpec((tm, tn), lambda i, j: (i, j)),
            compiler_params=pltpu.CompilerParams(
                dimension_semantics=("parallel", "parallel"),
                vmem_limit_bytes=_VMEM_LIMIT),
            cost_estimate=cost,
        )(x, w_t, b2d)

    tk = _pick_tile(K, (1024, 512, 256, 128), align=128)
    return pl.pallas_call(
        _linear_kernel_ktiled,
        out_shape=jax.ShapeDtypeStruct((M, N), out_dtype),
        grid=(M // tm, N // tn, K // tk),
        in_specs=[
            pl.BlockSpec((tm, tk), lambda i, j, k: (i, k)),
            pl.BlockSpec((tk, tn), lambda i, j, k: (k, j)),
            pl.BlockSpec((1, tn), lambda i, j, k: (0, j)),
        ],
        out_specs=pl.BlockSpec((tm, tn), lambda i, j, k: (i, j)),
        scratch_shapes=[pltpu.VMEM((tm, tn), jnp.float32)],
        compiler_params=pltpu.CompilerParams(
            dimension_semantics=("parallel", "parallel", "arbitrary"),
            vmem_limit_bytes=_VMEM_LIMIT),
        cost_estimate=cost,
    )(x, w_t, b2d)


# ---------------------------------------------------------------------------
# Flash-style multi-head attention (q/k/v and output in [B, S, H] layout)
# ---------------------------------------------------------------------------

def _mha_kernel(q_ref, k_ref, v_ref, mask_ref, o_ref, m_sc, l_sc, acc_sc,
                *, num_heads, head_dim, scale):
    ki = pl.program_id(2)

    @pl.when(ki == 0)
    def _():
        m_sc[...] = jnp.full(m_sc.shape, -jnp.inf, jnp.float32)
        l_sc[...] = jnp.zeros(l_sc.shape, jnp.float32)
        acc_sc[...] = jnp.zeros(acc_sc.shape, jnp.float32)

    mask = mask_ref[0]                               # (1, tkv) f32, key-only additive

    # Heads are a static loop over lane slices of the [*, H] blocks: plain 2-D MXU
    # dots in the natural projection layout (no batched dot_general, no relayout).
    for h in range(num_heads):
        sl = slice(h * head_dim, (h + 1) * head_dim)
        q = q_ref[0, :, sl] * scale                  # (tq,  d) bf16; scale on q (d << tkv)
        k = k_ref[0, :, sl]                          # (tkv, d) bf16
        v = v_ref[0, :, sl]                          # (tkv, d) bf16

        # scores = q @ k^T (contraction over head_dim), f32 accumulation
        s = lax.dot_general(q, k, (((1,), (1,)), ((), ())),
                            preferred_element_type=jnp.float32)   # (tq, tkv)
        s = s + mask

        m_prev = m_sc[h]                             # (tq, 128), lanes identical
        l_prev = l_sc[h]
        m_new = jnp.maximum(m_prev, jnp.max(s, axis=-1, keepdims=True))   # (tq, 128)
        alpha = jnp.exp(m_prev - m_new)                                   # (tq, 128)
        p = jnp.exp(s - m_new[:, :1])                                     # (tq, tkv)
        l_new = alpha * l_prev + jnp.sum(p, axis=-1, keepdims=True)       # (tq, 128)

        pv = jnp.dot(p.astype(v.dtype), v,
                     preferred_element_type=jnp.float32)                  # (tq, d)
        acc_sc[:, sl] = alpha[:, :1] * acc_sc[:, sl] + pv
        m_sc[h] = m_new
        l_sc[h] = l_new

    @pl.when(ki == pl.num_programs(2) - 1)
    def _():
        # Finalize into the lane-dense [*, H] output block (DMA'd back densely).
        for h in range(num_heads):
            sl = slice(h * head_dim, (h + 1) * head_dim)
            inv = pl.reciprocal(l_sc[h][:, :1], approx=True)              # (tq, 1)
            o_ref[0, :, sl] = (acc_sc[:, sl] * inv).astype(o_ref.dtype)


def flash_attention(q, k, v, key_mask, *, num_heads, scale):
    """q/k/v: [B, S, H] (head-major lanes); key_mask: additive [B, 1, S] f32.
    Returns [B, S, H] in q.dtype."""
    B, S, H = q.shape
    head_dim = H // num_heads

    tq = _pick_tile(S, (256, 128, 64, 32, 16, 8), align=8)
    tkv = _pick_tile(S, (1024, 512, 256, 128), align=128)
    nq, nkv = S // tq, S // tkv

    kernel = functools.partial(_mha_kernel, num_heads=num_heads,
                               head_dim=head_dim, scale=scale)

    cost = pl.CostEstimate(
        flops=4 * B * num_heads * S * S * head_dim,
        transcendentals=B * num_heads * S * S,
        bytes_accessed=int(4 * B * S * H * q.dtype.itemsize + B * S * 4),
    )

    # TODO(synk): skip fully-padded kv tiles via PrefetchScalarGridSpec with
    # per-batch valid key lengths (guard the body + clamp the k/v index maps).
    return pl.pallas_call(
        kernel,
        out_shape=jax.ShapeDtypeStruct((B, S, H), q.dtype),
        grid=(B, nq, nkv),
        in_specs=[
            pl.BlockSpec((1, tq, H), lambda b, qi, ki: (b, qi, 0)),
            pl.BlockSpec((1, tkv, H), lambda b, qi, ki: (b, ki, 0)),
            pl.BlockSpec((1, tkv, H), lambda b, qi, ki: (b, ki, 0)),
            pl.BlockSpec((1, 1, tkv), lambda b, qi, ki: (b, 0, ki)),
        ],
        out_specs=pl.BlockSpec((1, tq, H), lambda b, qi, ki: (b, qi, 0)),
        scratch_shapes=[
            pltpu.VMEM((num_heads, tq, 128), jnp.float32),   # running max (128-lane padded)
            pltpu.VMEM((num_heads, tq, 128), jnp.float32),   # running sum (128-lane padded)
            pltpu.VMEM((tq, H), jnp.float32),                # output accumulator (lane-dense)
        ],
        compiler_params=pltpu.CompilerParams(
            dimension_semantics=("parallel", "parallel", "arbitrary"),
            vmem_limit_bytes=_VMEM_LIMIT),
        cost_estimate=cost,
    )(q, k, v, key_mask)


# ---------------------------------------------------------------------------
# AttentionComponent forward (JAX glue around the Pallas kernels)
# ---------------------------------------------------------------------------

def attention_component_forward(params, hidden_states, attention_mask=None,
                                *, num_heads):
    """hidden_states: [S, B, H] -> output: [S, B, H]."""
    S, B, H = hidden_states.shape
    d = H // num_heads
    scale = 1.0 / math.sqrt(d)

    # Single input transpose to batch-major so attention can tile S per batch element.
    x = jnp.transpose(hidden_states, (1, 0, 2))            # [B, S, H]
    x2d = x.reshape(B * S, H).astype(jnp.bfloat16)

    # --- fused QKV projection (cramming: Linear(H, 3H)), bf16 operands / f32 acc ---
    w_qkv = params["w_qkv_t"].astype(jnp.bfloat16)
    qkv = linear(x2d, w_qkv, params["b_qkv"], out_dtype=jnp.bfloat16)   # [B*S, 3H]

    # cramming packing: columns are per-head interleaved (q,k,v) blocks of size d.
    # TODO(synk): when H % 128 == 0, read q/k/v directly out of the qkv slab with
    # three last-dim-offset BlockSpecs and drop these split copies entirely.
    qkv = qkv.reshape(B, S, num_heads, 3 * d)
    q, k, v = jnp.split(qkv, 3, axis=-1)                    # each [B, S, nH, d]
    q = q.reshape(B, S, H)
    k = k.reshape(B, S, H)
    v = v.reshape(B, S, H)

    # Additive key-only mask [B, 1, S] in f32 (no [B,1,S,S] materialization).
    if attention_mask is None:
        key_mask = jnp.zeros((B, 1, S), jnp.float32)
    else:
        am = jnp.asarray(attention_mask, jnp.float32)
        # Supported: key-only additive masks broadcastable to [B, 1, 1, S].
        # TODO(synk): general [B,1,S,S] per-query masks need a (qi,ki)-indexed BlockSpec.
        key_mask = jnp.broadcast_to(am, (B, 1, 1, S))[:, 0, 0, :].reshape(B, 1, S)

    ctx = flash_attention(q, k, v, key_mask, num_heads=num_heads, scale=scale)  # [B,S,H]

    # --- output projection: dense = Linear(H, H), f32 output ---
    w_dense = params["w_dense_t"].astype(jnp.bfloat16)
    out = linear(ctx.reshape(B * S, H), w_dense, params["b_dense"],
                 out_dtype=hidden_states.dtype)             # [B*S, H]
    out = out.reshape(B, S, H)
    return jnp.transpose(out, (1, 0, 2))                    # single output transpose -> [S,B,H]


# ---------------------------------------------------------------------------
# Deterministic parameter init (shapes implied by the module's __init__)
# ---------------------------------------------------------------------------

def init_params(key, hidden_size):
    k1, k2, k3, k4 = jax.random.split(key, 4)
    std = 0.02
    # torch Linear(H, 3H): weight [3H, H]; stored transposed [H, 3H] for x @ W^T.
    # Convention: fused QKV output columns are head-major with (q,k,v) interleaved per
    # head, matching cramming's reshape(..., nH, 3d).split(-1).  Verify against the
    # real checkpoint packing before loading trained weights.
    w_qkv = std * jax.random.normal(k1, (3 * hidden_size, hidden_size), jnp.float32)
    b_qkv = std * jax.random.normal(k2, (3 * hidden_size,), jnp.float32)
    w_dense = std * jax.random.normal(k3, (hidden_size, hidden_size), jnp.float32)
    b_dense = std * jax.random.normal(k4, (hidden_size,), jnp.float32)
    return {
        "w_qkv_t": w_qkv.T,
        "b_qkv": b_qkv,
        "w_dense_t": w_dense.T,
        "b_dense": b_dense,
    }


# ---------------------------------------------------------------------------
# Pure-JAX reference (same packing convention) for a loose parity check
# ---------------------------------------------------------------------------

def _reference_forward(params, hidden_states, attention_mask, num_heads):
    S, B, H = hidden_states.shape
    d = H // num_heads
    x = hidden_states.reshape(S * B, H)
    qkv = x @ params["w_qkv_t"] + params["b_qkv"]           # [S*B, 3H]
    qkv = qkv.reshape(S, B, num_heads, 3 * d)
    q, k, v = jnp.split(qkv, 3, axis=-1)                    # [S, B, nH, d]
    q = jnp.transpose(q, (1, 2, 0, 3))                      # [B, nH, S, d]
    k = jnp.transpose(k, (1, 2, 0, 3))
    v = jnp.transpose(v, (1, 2, 0, 3))
    scores = jnp.einsum("bhqd,bhkd->bhqk", q, k) / math.sqrt(d)
    if attention_mask is not None:
        scores = scores + jnp.asarray(attention_mask, jnp.float32).reshape(B, 1, 1, S)
    probs = jax.nn.softmax(scores, axis=-1)
    ctx = jnp.einsum("bhqk,bhkd->bhqd", probs, v)
    ctx = jnp.transpose(ctx, (2, 0, 1, 3)).reshape(S * B, H)
    out = ctx @ params["w_dense_t"] + params["b_dense"]
    return out.reshape(S, B, H)


# ---------------------------------------------------------------------------
# Main
# ---------------------------------------------------------------------------

if __name__ == "__main__":
    S, B, H, NUM_HEADS = 8, 2, 32, 4

    key = jax.random.PRNGKey(0)
    kp, kx = jax.random.split(key, 2)

    params = init_params(kp, H)
    hidden_states = jax.random.normal(kx, (S, B, H), jnp.float32)   # layout [S, B, H]

    # additive key-only attention mask [B, 1, 1, S]: mask out the last 2 keys
    mask_keep = jnp.arange(S) < (S - 2)
    attention_mask = jnp.where(mask_keep, 0.0, -1e9).astype(jnp.float32)
    attention_mask = jnp.broadcast_to(attention_mask.reshape(1, 1, 1, S), (B, 1, 1, S))

    fwd = jax.jit(functools.partial(attention_component_forward, num_heads=NUM_HEADS))
    out = jax.block_until_ready(fwd(params, hidden_states, attention_mask))

    assert out.shape == (S, B, H), out.shape
    assert bool(jnp.all(jnp.isfinite(out)))

    # Loose parity vs. a pure-JAX reference (bf16 matmuls + approx reciprocal inside).
    ref = _reference_forward(params, hidden_states, attention_mask, NUM_HEADS)
    assert bool(jnp.allclose(out, ref, rtol=2e-1, atol=2e-2)), \
        float(jnp.max(jnp.abs(out - ref)))

    print("KERNEL_OK")
</pallas_src>

<mosaic_0001>
module attributes {stable_mosaic.version = 11 : i64} {
  func.func @_linear_kernel(%arg0: i32, %arg1: i32, %arg2: memref<16x32xbf16, #tpu.memory_space<vmem>>, %arg3: memref<32x96xbf16, #tpu.memory_space<vmem>>, %arg4: memref<1x96xf32, #tpu.memory_space<vmem>>, %arg5: memref<16x96xbf16, #tpu.memory_space<vmem>>) attributes {dimension_semantics = [#tpu.dimension_semantics<parallel>, #tpu.dimension_semantics<parallel>], iteration_bounds = array<i64: 1, 1>, scalar_prefetch = 0 : i64, scratch_operands = 0 : i64, tpu.core_type = #tpu.core_type<tc>, window_params = [{transform_indices = @transform_0, window_bounds = array<i64: 16, 32>}, {transform_indices = @transform_1, window_bounds = array<i64: 32, 96>}, {transform_indices = @transform_2, window_bounds = array<i64: 1, 96>}, {transform_indices = @transform_3, window_bounds = array<i64: 16, 96>}]} {
    %c0 = arith.constant 0 : index
    %c0_0 = arith.constant 0 : index
    %0 = vector.load %arg2[%c0, %c0_0] : memref<16x32xbf16, #tpu.memory_space<vmem>>, vector<16x32xbf16>
    %c0_1 = arith.constant 0 : index
    %c0_2 = arith.constant 0 : index
    %1 = vector.load %arg3[%c0_1, %c0_2] : memref<32x96xbf16, #tpu.memory_space<vmem>>, vector<32x96xbf16>
    %cst = arith.constant dense<0.000000e+00> : vector<16x96xf32>
    %2 = tpu.matmul %0, %1, %cst {dimension_numbers = #tpu.dot_dimension_numbers<[1], [0], [0], [1], [0, 0, 1, 1], [], []>} : vector<16x32xbf16>, vector<32x96xbf16>, vector<16x96xf32> -> vector<16x96xf32>
    %c0_3 = arith.constant 0 : index
    %c0_4 = arith.constant 0 : index
    %3 = vector.load %arg4[%c0_3, %c0_4] : memref<1x96xf32, #tpu.memory_space<vmem>>, vector<1x96xf32>
    %4 = vector.broadcast %3 : vector<1x96xf32> to vector<16x96xf32>
    %5 = arith.addf %2, %4 : vector<16x96xf32>
    %6 = arith.truncf %5 : vector<16x96xf32> to vector<16x96xbf16>
    %c0_5 = arith.constant 0 : index
    %c0_6 = arith.constant 0 : index
    %7 = vector.load %arg5[%c0_5, %c0_6] : memref<16x96xbf16, #tpu.memory_space<vmem>>, vector<16x96xbf16>
    tpu.vector_store %arg5[%c0_5, %c0_6], %6 {strides = array<i32>} : memref<16x96xbf16, #tpu.memory_space<vmem>>, vector<16x96xbf16>,
    return
  }
  func.func @transform_0(%arg0: i32, %arg1: i32) -> (i32, i32) {
    %c0_i32 = arith.constant 0 : i32
    %c0_i32_0 = arith.constant 0 : i32
    return %arg0, %c0_i32 : i32, i32
  }
  func.func @transform_1(%arg0: i32, %arg1: i32) -> (i32, i32) {
    %c0_i32 = arith.constant 0 : i32
    %c0_i32_0 = arith.constant 0 : i32
    return %c0_i32, %arg1 : i32, i32
  }
  func.func @transform_2(%arg0: i32, %arg1: i32) -> (i32, i32) {
    %c0_i32 = arith.constant 0 : i32
    %c0_i32_0 = arith.constant 0 : i32
    return %c0_i32, %arg1 : i32, i32
  }
  func.func @transform_3(%arg0: i32, %arg1: i32) -> (i32, i32) {
    %c0_i32 = arith.constant 0 : i32
    return %arg0, %arg1 : i32, i32
  }
}

module attributes {stable_mosaic.version = 11 : i64} {
  func.func @_linear_kernel(%arg0: i32, %arg1: i32, %arg2: memref<16x32xbf16, #tpu.memory_space<vmem>>, %arg3: memref<32x32xbf16, #tpu.memory_space<vmem>>, %arg4: memref<1x32xf32, #tpu.memory_space<vmem>>, %arg5: memref<16x32xf32, #tpu.memory_space<vmem>>) attributes {dimension_semantics = [#tpu.dimension_semantics<parallel>, #tpu.dimension_semantics<parallel>], iteration_bounds = array<i64: 1, 1>, scalar_prefetch = 0 : i64, scratch_operands = 0 : i64, tpu.core_type = #tpu.core_type<tc>, window_params = [{transform_indices = @transform_0, window_bounds = array<i64: 16, 32>}, {transform_indices = @transform_1, window_bounds = array<i64: 32, 32>}, {transform_indices = @transform_2, window_bounds = array<i64: 1, 32>}, {transform_indices = @transform_3, window_bounds = array<i64: 16, 32>}]} {
    %c0 = arith.constant 0 : index
    %c0_0 = arith.constant 0 : index
    %0 = vector.load %arg2[%c0, %c0_0] : memref<16x32xbf16, #tpu.memory_space<vmem>>, vector<16x32xbf16>
    %c0_1 = arith.constant 0 : index
    %c0_2 = arith.constant 0 : index
    %1 = vector.load %arg3[%c0_1, %c0_2] : memref<32x32xbf16, #tpu.memory_space<vmem>>, vector<32x32xbf16>
    %cst = arith.constant dense<0.000000e+00> : vector<16x32xf32>
    %2 = tpu.matmul %0, %1, %cst {dimension_numbers = #tpu.dot_dimension_numbers<[1], [0], [0], [1], [0, 0, 1, 1], [], []>} : vector<16x32xbf16>, vector<32x32xbf16>, vector<16x32xf32> -> vector<16x32xf32>
    %c0_3 = arith.constant 0 : index
    %c0_4 = arith.constant 0 : index
    %3 = vector.load %arg4[%c0_3, %c0_4] : memref<1x32xf32, #tpu.memory_space<vmem>>, vector<1x32xf32>
    %4 = vector.broadcast %3 : vector<1x32xf32> to vector<16x32xf32>
    %5 = arith.addf %2, %4 : vector<16x32xf32>
    %c0_5 = arith.constant 0 : index
    %c0_6 = arith.constant 0 : index
    %6 = vector.load %arg5[%c0_5, %c0_6] : memref<16x32xf32, #tpu.memory_space<vmem>>, vector<16x32xf32>
    tpu.vector_store %arg5[%c0_5, %c0_6], %5 {strides = array<i32>} : memref<16x32xf32, #tpu.memory_space<vmem>>, vector<16x32xf32>,
    return
  }
  func.func @transform_0(%arg0: i32, %arg1: i32) -> (i32, i32) {
    %c0_i32 = arith.constant 0 : i32
    %c0_i32_0 = arith.constant 0 : i32
    return %arg0, %c0_i32 : i32, i32
  }
  func.func @transform_1(%arg0: i32, %arg1: i32) -> (i32, i32) {
    %c0_i32 = arith.constant 0 : i32
    %c0_i32_0 = arith.constant 0 : i32
    return %c0_i32, %arg1 : i32, i32
  }
  func.func @transform_2(%arg0: i32, %arg1: i32) -> (i32, i32) {
    %c0_i32 = arith.constant 0 : i32
    %c0_i32_0 = arith.constant 0 : i32
    return %c0_i32, %arg1 : i32, i32
  }
  func.func @transform_3(%arg0: i32, %arg1: i32) -> (i32, i32) {
    %c0_i32 = arith.constant 0 : i32
    return %arg0, %arg1 : i32, i32
  }
}

module attributes {stable_mosaic.version = 11 : i64} {
  func.func @_mha_kernel(%arg0: i32, %arg1: i32, %arg2: i32, %arg3: memref<1x8x32xbf16, #tpu.memory_space<vmem>>, %arg4: memref<1x8x32xbf16, #tpu.memory_space<vmem>>, %arg5: memref<1x8x32xbf16, #tpu.memory_space<vmem>>, %arg6: memref<1x1x8xf32, #tpu.memory_space<vmem>>, %arg7: memref<1x8x32xbf16, #tpu.memory_space<vmem>>, %arg8: memref<4x8x128xf32, #tpu.memory_space<vmem>>, %arg9: memref<4x8x128xf32, #tpu.memory_space<vmem>>, %arg10: memref<8x32xf32, #tpu.memory_space<vmem>>) attributes {dimension_semantics = [#tpu.dimension_semantics<parallel>, #tpu.dimension_semantics<parallel>, #tpu.dimension_semantics<arbitrary>], iteration_bounds = array<i64: 2, 1, 1>, scalar_prefetch = 0 : i64, scratch_operands = 3 : i64, tpu.core_type = #tpu.core_type<tc>, window_params = [{transform_indices = @transform_0, window_bounds = array<i64: 1, 8, 32>}, {transform_indices = @transform_1, window_bounds = array<i64: 1, 8, 32>}, {transform_indices = @transform_2, window_bounds = array<i64: 1, 8, 32>}, {transform_indices = @transform_3, window_bounds = array<i64: 1, 1, 8>}, {transform_indices = @transform_4, window_bounds = array<i64: 1, 8, 32>}]} {
    %c0_i32 = arith.constant 0 : i32
    %0 = arith.cmpi eq, %arg2, %c0_i32 : i32
    %1 = arith.extui %0 : i1 to i32
    %c0_i32_0 = arith.constant 0 : i32
    %2 = arith.cmpi ne, %1, %c0_i32_0 : i32
    scf.if %2 {
      %cst_118 = arith.constant 0xFF800000 : f32
      %184 = vector.broadcast %cst_118 : f32 to vector<4x8x128xf32>
      %c0_119 = arith.constant 0 : index
      %c0_120 = arith.constant 0 : index
      %c0_121 = arith.constant 0 : index
      %185 = vector.load %arg8[%c0_119, %c0_120, %c0_121] : memref<4x8x128xf32, #tpu.memory_space<vmem>>, vector<4x8x128xf32>
      tpu.vector_store %arg8[%c0_119, %c0_120, %c0_121], %184 {strides = array<i32>} : memref<4x8x128xf32, #tpu.memory_space<vmem>>, vector<4x8x128xf32>,
      %cst_122 = arith.constant 0.000000e+00 : f32
      %186 = vector.broadcast %cst_122 : f32 to vector<4x8x128xf32>
      %c0_123 = arith.constant 0 : index
      %c0_124 = arith.constant 0 : index
      %c0_125 = arith.constant 0 : index
      %187 = vector.load %arg9[%c0_123, %c0_124, %c0_125] : memref<4x8x128xf32, #tpu.memory_space<vmem>>, vector<4x8x128xf32>
      tpu.vector_store %arg9[%c0_123, %c0_124, %c0_125], %186 {strides = array<i32>} : memref<4x8x128xf32, #tpu.memory_space<vmem>>, vector<4x8x128xf32>,
      %cst_126 = arith.constant 0.000000e+00 : f32
      %188 = vector.broadcast %cst_126 : f32 to vector<8x32xf32>
      %c0_127 = arith.constant 0 : index
      %c0_128 = arith.constant 0 : index
      %189 = vector.load %arg10[%c0_127, %c0_128] : memref<8x32xf32, #tpu.memory_space<vmem>>, vector<8x32xf32>
      tpu.vector_store %arg10[%c0_127, %c0_128], %188 {strides = array<i32>} : memref<8x32xf32, #tpu.memory_space<vmem>>, vector<8x32xf32>,
    } else {
    }
    %c0 = arith.constant 0 : index
    %c0_1 = arith.constant 0 : index
    %c0_2 = arith.constant 0 : index
    %3 = vector.load %arg6[%c0, %c0_1, %c0_2] : memref<1x1x8xf32, #tpu.memory_space<vmem>>, vector<1x1x8xf32>
    %4 = vector.shape_cast %3 : vector<1x1x8xf32> to vector<1x8xf32>
    %c0_3 = arith.constant 0 : index
    %c0_4 = arith.constant 0 : index
    %c0_5 = arith.constant 0 : index
    %5 = vector.load %arg3[%c0_3, %c0_4, %c0_5] : memref<1x8x32xbf16, #tpu.memory_space<vmem>>, vector<1x8x8xbf16>
    %6 = vector.shape_cast %5 : vector<1x8x8xbf16> to vector<8x8xbf16>
    %cst = arith.constant 3.535160e-01 : bf16
    %7 = vector.broadcast %cst : bf16 to vector<8x8xbf16>
    %8 = arith.mulf %6, %7 : vector<8x8xbf16>
    %c0_6 = arith.constant 0 : index
    %c0_7 = arith.constant 0 : index
    %c0_8 = arith.constant 0 : index
    %9 = vector.load %arg4[%c0_6, %c0_7, %c0_8] : memref<1x8x32xbf16, #tpu.memory_space<vmem>>, vector<1x8x8xbf16>
    %10 = vector.shape_cast %9 : vector<1x8x8xbf16> to vector<8x8xbf16>
    %c0_9 = arith.constant 0 : index
    %c0_10 = arith.constant 0 : index
    %c0_11 = arith.constant 0 : index
    %11 = vector.load %arg5[%c0_9, %c0_10, %c0_11] : memref<1x8x32xbf16, #tpu.memory_space<vmem>>, vector<1x8x8xbf16>
    %12 = vector.shape_cast %11 : vector<1x8x8xbf16> to vector<8x8xbf16>
    %cst_12 = arith.constant dense<0.000000e+00> : vector<8x8xf32>
    %13 = tpu.matmul %8, %10, %cst_12 {dimension_numbers = #tpu.dot_dimension_numbers<[1], [1], [0], [0], [0, 0, 1, 0], [], []>} : vector<8x8xbf16>, vector<8x8xbf16>, vector<8x8xf32> -> vector<8x8xf32>
    %14 = vector.broadcast %4 : vector<1x8xf32> to vector<8x8xf32>
    %15 = arith.addf %13, %14 : vector<8x8xf32>
    %c0_13 = arith.constant 0 : index
    %c0_14 = arith.constant 0 : index
    %c0_15 = arith.constant 0 : index
    %16 = vector.load %arg8[%c0_13, %c0_14, %c0_15] : memref<4x8x128xf32, #tpu.memory_space<vmem>>, vector<1x8x128xf32>
    %17 = vector.shape_cast %16 : vector<1x8x128xf32> to vector<8x128xf32>
    %c0_16 = arith.constant 0 : index
    %c0_17 = arith.constant 0 : index
    %c0_18 = arith.constant 0 : index
    %18 = vector.load %arg9[%c0_16, %c0_17, %c0_18] : memref<4x8x128xf32, #tpu.memory_space<vmem>>, vector<1x8x128xf32>
    %19 = vector.shape_cast %18 : vector<1x8x128xf32> to vector<8x128xf32>
    %cst_19 = arith.constant dense<0xFF800000> : vector<8xf32>
    %20 = vector.multi_reduction <maximumf>, %15, %cst_19 [1] : vector<8x8xf32> to vector<8xf32>
    %21 = vector.shape_cast %20 : vector<8xf32> to vector<8x1xf32>
    %22 = vector.broadcast %21 : vector<8x1xf32> to vector<8x128xf32>
    %23 = arith.maximumf %17, %22 : vector<8x128xf32>
    %24 = arith.subf %17, %23 : vector<8x128xf32>
    %25 = math.exp %24 : vector<8x128xf32>
    %26 = vector.extract_strided_slice %23 {offsets = [0, 0], sizes = [8, 1], strides = [1, 1]} : vector<8x128xf32> to vector<8x1xf32>
    %27 = vector.broadcast %26 : vector<8x1xf32> to vector<8x8xf32>
    %28 = arith.subf %15, %27 : vector<8x8xf32>
    %29 = math.exp %28 : vector<8x8xf32>
    %30 = arith.mulf %25, %19 : vector<8x128xf32>
    %cst_20 = arith.constant dense<0.000000e+00> : vector<8xf32>
    %31 = vector.multi_reduction <add>, %29, %cst_20 [1] : vector<8x8xf32> to vector<8xf32>
    %32 = vector.shape_cast %31 : vector<8xf32> to vector<8x1xf32>
    %33 = vector.broadcast %32 : vector<8x1xf32> to vector<8x128xf32>
    %34 = arith.addf %30, %33 : vector<8x128xf32>
    %35 = arith.truncf %29 : vector<8x8xf32> to vector<8x8xbf16>
    %cst_21 = arith.constant dense<0.000000e+00> : vector<8x8xf32>
    %36 = tpu.matmul %35, %12, %cst_21 {dimension_numbers = #tpu.dot_dimension_numbers<[1], [0], [0], [1], [0, 0, 1, 1], [], []>} : vector<8x8xbf16>, vector<8x8xbf16>, vector<8x8xf32> -> vector<8x8xf32>
    %37 = vector.extract_strided_slice %25 {offsets = [0, 0], sizes = [8, 1], strides = [1, 1]} : vector<8x128xf32> to vector<8x1xf32>
    %c0_22 = arith.constant 0 : index
    %c0_23 = arith.constant 0 : index
    %38 = vector.load %arg10[%c0_22, %c0_23] : memref<8x32xf32, #tpu.memory_space<vmem>>, vector<8x8xf32>
    %39 = vector.broadcast %37 : vector<8x1xf32> to vector<8x8xf32>
    %40 = arith.mulf %39, %38 : vector<8x8xf32>
    %41 = arith.addf %40, %36 : vector<8x8xf32>
    %c0_24 = arith.constant 0 : index
    %c0_25 = arith.constant 0 : index
    %42 = vector.load %arg10[%c0_24, %c0_25] : memref<8x32xf32, #tpu.memory_space<vmem>>, vector<8x8xf32>
    tpu.vector_store %arg10[%c0_24, %c0_25], %41 {strides = array<i32>} : memref<8x32xf32, #tpu.memory_space<vmem>>, vector<8x8xf32>,
    %c0_26 = arith.constant 0 : index
    %c0_27 = arith.constant 0 : index
    %c0_28 = arith.constant 0 : index
    %43 = vector.load %arg8[%c0_26, %c0_27, %c0_28] : memref<4x8x128xf32, #tpu.memory_space<vmem>>, vector<1x8x128xf32>
    %44 = vector.shape_cast %43 : vector<1x8x128xf32> to vector<8x128xf32>
    %45 = vector.shape_cast %23 : vector<8x128xf32> to vector<1x8x128xf32>
    tpu.vector_store %arg8[%c0_26, %c0_27, %c0_28], %45 {strides = array<i32>} : memref<4x8x128xf32, #tpu.memory_space<vmem>>, vector<1x8x128xf32>,
    %c0_29 = arith.constant 0 : index
    %c0_30 = arith.constant 0 : index
    %c0_31 = arith.constant 0 : index
    %46 = vector.load %arg9[%c0_29, %c0_30, %c0_31] : memref<4x8x128xf32, #tpu.memory_space<vmem>>, vector<1x8x128xf32>
    %47 = vector.shape_cast %46 : vector<1x8x128xf32> to vector<8x128xf32>
    %48 = vector.shape_cast %34 : vector<8x128xf32> to vector<1x8x128xf32>
    tpu.vector_store %arg9[%c0_29, %c0_30, %c0_31], %48 {strides = array<i32>} : memref<4x8x128xf32, #tpu.memory_space<vmem>>, vector<1x8x128xf32>,
    %c0_32 = arith.constant 0 : index
    %c0_33 = arith.constant 0 : index
    %c8 = arith.constant 8 : index
    %49 = vector.load %arg3[%c0_32, %c0_33, %c8] : memref<1x8x32xbf16, #tpu.memory_space<vmem>>, vector<1x8x8xbf16>
    %50 = vector.shape_cast %49 : vector<1x8x8xbf16> to vector<8x8xbf16>
    %cst_34 = arith.constant 3.535160e-01 : bf16
    %51 = vector.broadcast %cst_34 : bf16 to vector<8x8xbf16>
    %52 = arith.mulf %50, %51 : vector<8x8xbf16>
    %c0_35 = arith.constant 0 : index
    %c0_36 = arith.constant 0 : index
    %c8_37 = arith.constant 8 : index
    %53 = vector.load %arg4[%c0_35, %c0_36, %c8_37] : memref<1x8x32xbf16, #tpu.memory_space<vmem>>, vector<1x8x8xbf16>
    %54 = vector.shape_cast %53 : vector<1x8x8xbf16> to vector<8x8xbf16>
    %c0_38 = arith.constant 0 : index
    %c0_39 = arith.constant 0 : index
    %c8_40 = arith.constant 8 : index
    %55 = vector.load %arg5[%c0_38, %c0_39, %c8_40] : memref<1x8x32xbf16, #tpu.memory_space<vmem>>, vector<1x8x8xbf16>
    %56 = vector.shape_cast %55 : vector<1x8x8xbf16> to vector<8x8xbf16>
    %cst_41 = arith.constant dense<0.000000e+00> : vector<8x8xf32>
    %57 = tpu.matmul %52, %54, %cst_41 {dimension_numbers = #tpu.dot_dimension_numbers<[1], [1], [0], [0], [0, 0, 1, 0], [], []>} : vector<8x8xbf16>, vector<8x8xbf16>, vector<8x8xf32> -> vector<8x8xf32>
    %58 = vector.broadcast %4 : vector<1x8xf32> to vector<8x8xf32>
    %59 = arith.addf %57, %58 : vector<8x8xf32>
    %c1 = arith.constant 1 : index
    %c0_42 = arith.constant 0 : index
    %c0_43 = arith.constant 0 : index
    %60 = vector.load %arg8[%c1, %c0_42, %c0_43] : memref<4x8x128xf32, #tpu.memory_space<vmem>>, vector<1x8x128xf32>
    %61 = vector.shape_cast %60 : vector<1x8x128xf32> to vector<8x128xf32>
    %c1_44 = arith.constant 1 : index
    %c0_45 = arith.constant 0 : index
    %c0_46 = arith.constant 0 : index
    %62 = vector.load %arg9[%c1_44, %c0_45, %c0_46] : memref<4x8x128xf32, #tpu.memory_space<vmem>>, vector<1x8x128xf32>
    %63 = vector.shape_cast %62 : vector<1x8x128xf32> to vector<8x128xf32>
    %cst_47 = arith.constant dense<0xFF800000> : vector<8xf32>
    %64 = vector.multi_reduction <maximumf>, %59, %cst_47 [1] : vector<8x8xf32> to vector<8xf32>
    %65 = vector.shape_cast %64 : vector<8xf32> to vector<8x1xf32>
    %66 = vector.broadcast %65 : vector<8x1xf32> to vector<8x128xf32>
    %67 = arith.maximumf %61, %66 : vector<8x128xf32>
    %68 = arith.subf %61, %67 : vector<8x128xf32>
    %69 = math.exp %68 : vector<8x128xf32>
    %70 = vector.extract_strided_slice %67 {offsets = [0, 0], sizes = [8, 1], strides = [1, 1]} : vector<8x128xf32> to vector<8x1xf32>
    %71 = vector.broadcast %70 : vector<8x1xf32> to vector<8x8xf32>
    %72 = arith.subf %59, %71 : vector<8x8xf32>
    %73 = math.exp %72 : vector<8x8xf32>
    %74 = arith.mulf %69, %63 : vector<8x128xf32>
    %cst_48 = arith.constant dense<0.000000e+00> : vector<8xf32>
    %75 = vector.multi_reduction <add>, %73, %cst_48 [1] : vector<8x8xf32> to vector<8xf32>
    %76 = vector.shape_cast %75 : vector<8xf32> to vector<8x1xf32>
    %77 = vector.broadcast %76 : vector<8x1xf32> to vector<8x128xf32>
    %78 = arith.addf %74, %77 : vector<8x128xf32>
    %79 = arith.truncf %73 : vector<8x8xf32> to vector<8x8xbf16>
    %cst_49 = arith.constant dense<0.000000e+00> : vector<8x8xf32>
    %80 = tpu.matmul %79, %56, %cst_49 {dimension_numbers = #tpu.dot_dimension_numbers<[1], [0], [0], [1], [0, 0, 1, 1], [], []>} : vector<8x8xbf16>, vector<8x8xbf16>, vector<8x8xf32> -> vector<8x8xf32>
    %81 = vector.extract_strided_slice %69 {offsets = [0, 0], sizes = [8, 1], strides = [1, 1]} : vector<8x128xf32> to vector<8x1xf32>
    %c0_50 = arith.constant 0 : index
    %c8_51 = arith.constant 8 : index
    %82 = vector.load %arg10[%c0_50, %c8_51] : memref<8x32xf32, #tpu.memory_space<vmem>>, vector<8x8xf32>
    %83 = vector.broadcast %81 : vector<8x1xf32> to vector<8x8xf32>
    %84 = arith.mulf %83, %82 : vector<8x8xf32>
    %85 = arith.addf %84, %80 : vector<8x8xf32>
    %c0_52 = arith.constant 0 : index
    %c8_53 = arith.constant 8 : index
    %86 = vector.load %arg10[%c0_52, %c8_53] : memref<8x32xf32, #tpu.memory_space<vmem>>, vector<8x8xf32>
    tpu.vector_store %arg10[%c0_52, %c8_53], %85 {strides = array<i32>} : memref<8x32xf32, #tpu.memory_space<vmem>>, vector<8x8xf32>,
    %c1_54 = arith.constant 1 : index
    %c0_55 = arith.constant 0 : index
    %c0_56 = arith.constant 0 : index
    %87 = vector.load %arg8[%c1_54, %c0_55, %c0_56] : memref<4x8x128xf32, #tpu.memory_space<vmem>>, vector<1x8x128xf32>
    %88 = vector.shape_cast %87 : vector<1x8x128xf32> to vector<8x128xf32>
    %89 = vector.shape_cast %67 : vector<8x128xf32> to vector<1x8x128xf32>
    tpu.vector_store %arg8[%c1_54, %c0_55, %c0_56], %89 {strides = array<i32>} : memref<4x8x128xf32, #tpu.memory_space<vmem>>, vector<1x8x128xf32>,
    %c1_57 = arith.constant 1 : index
    %c0_58 = arith.constant 0 : index
    %c0_59 = arith.constant 0 : index
    %90 = vector.load %arg9[%c1_57, %c0_58, %c0_59] : memref<4x8x128xf32, #tpu.memory_space<vmem>>, vector<1x8x128xf32>
    %91 = vector.shape_cast %90 : vector<1x8x128xf32> to vector<8x128xf32>
    %92 = vector.shape_cast %78 : vector<8x128xf32> to vector<1x8x128xf32>
    tpu.vector_store %arg9[%c1_57, %c0_58, %c0_59], %92 {strides = array<i32>} : memref<4x8x128xf32, #tpu.memory_space<vmem>>, vector<1x8x128xf32>,
    %c0_60 = arith.constant 0 : index
    %c0_61 = arith.constant 0 : index
    %c16 = arith.constant 16 : index
    %93 = vector.load %arg3[%c0_60, %c0_61, %c16] : memref<1x8x32xbf16, #tpu.memory_space<vmem>>, vector<1x8x8xbf16>
    %94 = vector.shape_cast %93 : vector<1x8x8xbf16> to vector<8x8xbf16>
    %cst_62 = arith.constant 3.535160e-01 : bf16
    %95 = vector.broadcast %cst_62 : bf16 to vector<8x8xbf16>
    %96 = arith.mulf %94, %95 : vector<8x8xbf16>
    %c0_63 = arith.constant 0 : index
    %c0_64 = arith.constant 0 : index
    %c16_65 = arith.constant 16 : index
    %97 = vector.load %arg4[%c0_63, %c0_64, %c16_65] : memref<1x8x32xbf16, #tpu.memory_space<vmem>>, vector<1x8x8xbf16>
    %98 = vector.shape_cast %97 : vector<1x8x8xbf16> to vector<8x8xbf16>
    %c0_66 = arith.constant 0 : index
    %c0_67 = arith.constant 0 : index
    %c16_68 = arith.constant 16 : index
    %99 = vector.load %arg5[%c0_66, %c0_67, %c16_68] : memref<1x8x32xbf16, #tpu.memory_space<vmem>>, vector<1x8x8xbf16>
    %100 = vector.shape_cast %99 : vector<1x8x8xbf16> to vector<8x8xbf16>
    %cst_69 = arith.constant dense<0.000000e+00> : vector<8x8xf32>
    %101 = tpu.matmul %96, %98, %cst_69 {dimension_numbers = #tpu.dot_dimension_numbers<[1], [1], [0], [0], [0, 0, 1, 0], [], []>} : vector<8x8xbf16>, vector<8x8xbf16>, vector<8x8xf32> -> vector<8x8xf32>
    %102 = vector.broadcast %4 : vector<1x8xf32> to vector<8x8xf32>
    %103 = arith.addf %101, %102 : vector<8x8xf32>
    %c2 = arith.constant 2 : index
    %c0_70 = arith.constant 0 : index
    %c0_71 = arith.constant 0 : index
    %104 = vector.load %arg8[%c2, %c0_70, %c0_71] : memref<4x8x128xf32, #tpu.memory_space<vmem>>, vector<1x8x128xf32>
    %105 = vector.shape_cast %104 : vector<1x8x128xf32> to vector<8x128xf32>
    %c2_72 = arith.constant 2 : index
    %c0_73 = arith.constant 0 : index
    %c0_74 = arith.constant 0 : index
    %106 = vector.load %arg9[%c2_72, %c0_73, %c0_74] : memref<4x8x128xf32, #tpu.memory_space<vmem>>, vector<1x8x128xf32>
    %107 = vector.shape_cast %106 : vector<1x8x128xf32> to vector<8x128xf32>
    %cst_75 = arith.constant dense<0xFF800000> : vector<8xf32>
    %108 = vector.multi_reduction <maximumf>, %103, %cst_75 [1] : vector<8x8xf32> to vector<8xf32>
    %109 = vector.shape_cast %108 : vector<8xf32> to vector<8x1xf32>
    %110 = vector.broadcast %109 : vector<8x1xf32> to vector<8x128xf32>
    %111 = arith.maximumf %105, %110 : vector<8x128xf32>
    %112 = arith.subf %105, %111 : vector<8x128xf32>
    %113 = math.exp %112 : vector<8x128xf32>
    %114 = vector.extract_strided_slice %111 {offsets = [0, 0], sizes = [8, 1], strides = [1, 1]} : vector<8x128xf32> to vector<8x1xf32>
    %115 = vector.broadcast %114 : vector<8x1xf32> to vector<8x8xf32>
    %116 = arith.subf %103, %115 : vector<8x8xf32>
    %117 = math.exp %116 : vector<8x8xf32>
    %118 = arith.mulf %113, %107 : vector<8x128xf32>
    %cst_76 = arith.constant dense<0.000000e+00> : vector<8xf32>
    %119 = vector.multi_reduction <add>, %117, %cst_76 [1] : vector<8x8xf32> to vector<8xf32>
    %120 = vector.shape_cast %119 : vector<8xf32> to vector<8x1xf32>
    %121 = vector.broadcast %120 : vector<8x1xf32> to vector<8x128xf32>
    %122 = arith.addf %118, %121 : vector<8x128xf32>
    %123 = arith.truncf %117 : vector<8x8xf32> to vector<8x8xbf16>
    %cst_77 = arith.constant dense<0.000000e+00> : vector<8x8xf32>
    %124 = tpu.matmul %123, %100, %cst_77 {dimension_numbers = #tpu.dot_dimension_numbers<[1], [0], [0], [1], [0, 0, 1, 1], [], []>} : vector<8x8xbf16>, vector<8x8xbf16>, vector<8x8xf32> -> vector<8x8xf32>
    %125 = vector.extract_strided_slice %113 {offsets = [0, 0], sizes = [8, 1], strides = [1, 1]} : vector<8x128xf32> to vector<8x1xf32>
    %c0_78 = arith.constant 0 : index
    %c16_79 = arith.constant 16 : index
    %126 = vector.load %arg10[%c0_78, %c16_79] : memref<8x32xf32, #tpu.memory_space<vmem>>, vector<8x8xf32>
    %127 = vector.broadcast %125 : vector<8x1xf32> to vector<8x8xf32>
    %128 = arith.mulf %127, %126 : vector<8x8xf32>
    %129 = arith.addf %128, %124 : vector<8x8xf32>
    %c0_80 = arith.constant 0 : index
    %c16_81 = arith.constant 16 : index
    %130 = vector.load %arg10[%c0_80, %c16_81] : memref<8x32xf32, #tpu.memory_space<vmem>>, vector<8x8xf32>
    tpu.vector_store %arg10[%c0_80, %c16_81], %129 {strides = array<i32>} : memref<8x32xf32, #tpu.memory_space<vmem>>, vector<8x8xf32>,
    %c2_82 = arith.constant 2 : index
    %c0_83 = arith.constant 0 : index
    %c0_84 = arith.constant 0 : index
    %131 = vector.load %arg8[%c2_82, %c0_83, %c0_84] : memref<4x8x128xf32, #tpu.memory_space<vmem>>, vector<1x8x128xf32>
    %132 = vector.shape_cast %131 : vector<1x8x128xf32> to vector<8x128xf32>
    %133 = vector.shape_cast %111 : vector<8x128xf32> to vector<1x8x128xf32>
    tpu.vector_store %arg8[%c2_82, %c0_83, %c0_84], %133 {strides = array<i32>} : memref<4x8x128xf32, #tpu.memory_space<vmem>>, vector<1x8x128xf32>,
    %c2_85 = arith.constant 2 : index
    %c0_86 = arith.constant 0 : index
    %c0_87 = arith.constant 0 : index
    %134 = vector.load %arg9[%c2_85, %c0_86, %c0_87] : memref<4x8x128xf32, #tpu.memory_space<vmem>>, vector<1x8x128xf32>
    %135 = vector.shape_cast %134 : vector<1x8x128xf32> to vector<8x128xf32>
    %136 = vector.shape_cast %122 : vector<8x128xf32> to vector<1x8x128xf32>
    tpu.vector_store %arg9[%c2_85, %c0_86, %c0_87], %136 {strides = array<i32>} : memref<4x8x128xf32, #tpu.memory_space<vmem>>, vector<1x8x128xf32>,
    %c0_88 = arith.constant 0 : index
    %c0_89 = arith.constant 0 : index
    %c24 = arith.constant 24 : index
    %137 = vector.load %arg3[%c0_88, %c0_89, %c24] : memref<1x8x32xbf16, #tpu.memory_space<vmem>>, vector<1x8x8xbf16>
    %138 = vector.shape_cast %137 : vector<1x8x8xbf16> to vector<8x8xbf16>
    %cst_90 = arith.constant 3.535160e-01 : bf16
    %139 = vector.broadcast %cst_90 : bf16 to vector<8x8xbf16>
    %140 = arith.mulf %138, %139 : vector<8x8xbf16>
    %c0_91 = arith.constant 0 : index
    %c0_92 = arith.constant 0 : index
    %c24_93 = arith.constant 24 : index
    %141 = vector.load %arg4[%c0_91, %c0_92, %c24_93] : memref<1x8x32xbf16, #tpu.memory_space<vmem>>, vector<1x8x8xbf16>
    %142 = vector.shape_cast %141 : vector<1x8x8xbf16> to vector<8x8xbf16>
    %c0_94 = arith.constant 0 : index
    %c0_95 = arith.constant 0 : index
    %c24_96 = arith.constant 24 : index
    %143 = vector.load %arg5[%c0_94, %c0_95, %c24_96] : memref<1x8x32xbf16, #tpu.memory_space<vmem>>, vector<1x8x8xbf16>
    %144 = vector.shape_cast %143 : vector<1x8x8xbf16> to vector<8x8xbf16>
    %cst_97 = arith.constant dense<0.000000e+00> : vector<8x8xf32>
    %145 = tpu.matmul %140, %142, %cst_97 {dimension_numbers = #tpu.dot_dimension_numbers<[1], [1], [0], [0], [0, 0, 1, 0], [], []>} : vector<8x8xbf16>, vector<8x8xbf16>, vector<8x8xf32> -> vector<8x8xf32>
    %146 = vector.broadcast %4 : vector<1x8xf32> to vector<8x8xf32>
    %147 = arith.addf %145, %146 : vector<8x8xf32>
    %c3 = arith.constant 3 : index
    %c0_98 = arith.constant 0 : index
    %c0_99 = arith.constant 0 : index
    %148 = vector.load %arg8[%c3, %c0_98, %c0_99] : memref<4x8x128xf32, #tpu.memory_space<vmem>>, vector<1x8x128xf32>
    %149 = vector.shape_cast %148 : vector<1x8x128xf32> to vector<8x128xf32>
    %c3_100 = arith.constant 3 : index
    %c0_101 = arith.constant 0 : index
    %c0_102 = arith.constant 0 : index
    %150 = vector.load %arg9[%c3_100, %c0_101, %c0_102] : memref<4x8x128xf32, #tpu.memory_space<vmem>>, vector<1x8x128xf32>
    %151 = vector.shape_cast %150 : vector<1x8x128xf32> to vector<8x128xf32>
    %cst_103 = arith.constant dense<0xFF800000> : vector<8xf32>
    %152 = vector.multi_reduction <maximumf>, %147, %cst_103 [1] : vector<8x8xf32> to vector<8xf32>
    %153 = vector.shape_cast %152 : vector<8xf32> to vector<8x1xf32>
    %154 = vector.broadcast %153 : vector<8x1xf32> to vector<8x128xf32>
    %155 = arith.maximumf %149, %154 : vector<8x128xf32>
    %156 = arith.subf %149, %155 : vector<8x128xf32>
    %157 = math.exp %156 : vector<8x128xf32>
    %158 = vector.extract_strided_slice %155 {offsets = [0, 0], sizes = [8, 1], strides = [1, 1]} : vector<8x128xf32> to vector<8x1xf32>
    %159 = vector.broadcast %158 : vector<8x1xf32> to vector<8x8xf32>
    %160 = arith.subf %147, %159 : vector<8x8xf32>
    %161 = math.exp %160 : vector<8x8xf32>
    %162 = arith.mulf %157, %151 : vector<8x128xf32>
    %cst_104 = arith.constant dense<0.000000e+00> : vector<8xf32>
    %163 = vector.multi_reduction <add>, %161, %cst_104 [1] : vector<8x8xf32> to vector<8xf32>
    %164 = vector.shape_cast %163 : vector<8xf32> to vector<8x1xf32>
    %165 = vector.broadcast %164 : vector<8x1xf32> to vector<8x128xf32>
    %166 = arith.addf %162, %165 : vector<8x128xf32>
    %167 = arith.truncf %161 : vector<8x8xf32> to vector<8x8xbf16>
    %cst_105 = arith.constant dense<0.000000e+00> : vector<8x8xf32>
    %168 = tpu.matmul %167, %144, %cst_105 {dimension_numbers = #tpu.dot_dimension_numbers<[1], [0], [0], [1], [0, 0, 1, 1], [], []>} : vector<8x8xbf16>, vector<8x8xbf16>, vector<8x8xf32> -> vector<8x8xf32>
    %169 = vector.extract_strided_slice %157 {offsets = [0, 0], sizes = [8, 1], strides = [1, 1]} : vector<8x128xf32> to vector<8x1xf32>
    %c0_106 = arith.constant 0 : index
    %c24_107 = arith.constant 24 : index
    %170 = vector.load %arg10[%c0_106, %c24_107] : memref<8x32xf32, #tpu.memory_space<vmem>>, vector<8x8xf32>
    %171 = vector.broadcast %169 : vector<8x1xf32> to vector<8x8xf32>
    %172 = arith.mulf %171, %170 : vector<8x8xf32>
    %173 = arith.addf %172, %168 : vector<8x8xf32>
    %c0_108 = arith.constant 0 : index
    %c24_109 = arith.constant 24 : index
    %174 = vector.load %arg10[%c0_108, %c24_109] : memref<8x32xf32, #tpu.memory_space<vmem>>, vector<8x8xf32>
    tpu.vector_store %arg10[%c0_108, %c24_109], %173 {strides = array<i32>} : memref<8x32xf32, #tpu.memory_space<vmem>>, vector<8x8xf32>,
    %c3_110 = arith.constant 3 : index
    %c0_111 = arith.constant 0 : index
    %c0_112 = arith.constant 0 : index
    %175 = vector.load %arg8[%c3_110, %c0_111, %c0_112] : memref<4x8x128xf32, #tpu.memory_space<vmem>>, vector<1x8x128xf32>
    %176 = vector.shape_cast %175 : vector<1x8x128xf32> to vector<8x128xf32>
    %177 = vector.shape_cast %155 : vector<8x128xf32> to vector<1x8x128xf32>
    tpu.vector_store %arg8[%c3_110, %c0_111, %c0_112], %177 {strides = array<i32>} : memref<4x8x128xf32, #tpu.memory_space<vmem>>, vector<1x8x128xf32>,
    %c3_113 = arith.constant 3 : index
    %c0_114 = arith.constant 0 : index
    %c0_115 = arith.constant 0 : index
    %178 = vector.load %arg9[%c3_113, %c0_114, %c0_115] : memref<4x8x128xf32, #tpu.memory_space<vmem>>, vector<1x8x128xf32>
    %179 = vector.shape_cast %178 : vector<1x8x128xf32> to vector<8x128xf32>
    %180 = vector.shape_cast %166 : vector<8x128xf32> to vector<1x8x128xf32>
    tpu.vector_store %arg9[%c3_113, %c0_114, %c0_115], %180 {strides = array<i32>} : memref<4x8x128xf32, #tpu.memory_space<vmem>>, vector<1x8x128xf32>,
    %c0_i32_116 = arith.constant 0 : i32
    %181 = arith.cmpi eq, %arg2, %c0_i32_116 : i32
    %182 = arith.extui %181 : i1 to i32
    %c0_i32_117 = arith.constant 0 : i32
    %183 = arith.cmpi ne, %182, %c0_i32_117 : i32
    scf.if %183 {
      %c0_118 = arith.constant 0 : index
      %c0_119 = arith.constant 0 : index
      %c0_120 = arith.constant 0 : index
      %184 = vector.load %arg9[%c0_118, %c0_119, %c0_120] : memref<4x8x128xf32, #tpu.memory_space<vmem>>, vector<1x8x128xf32>
      %185 = vector.shape_cast %184 : vector<1x8x128xf32> to vector<8x128xf32>
      %186 = vector.extract_strided_slice %185 {offsets = [0, 0], sizes = [8, 1], strides = [1, 1]} : vector<8x128xf32> to vector<8x1xf32>
      %187 = tpu.reciprocal %186 {approx = true} : vector<8x1xf32> -> vector<8x1xf32>
      %c0_121 = arith.constant 0 : index
      %c0_122 = arith.constant 0 : index
      %188 = vector.load %arg10[%c0_121, %c0_122] : memref<8x32xf32, #tpu.memory_space<vmem>>, vector<8x8xf32>
      %189 = vector.broadcast %187 : vector<8x1xf32> to vector<8x8xf32>
      %190 = arith.mulf %188, %189 : vector<8x8xf32>
      %191 = arith.truncf %190 : vector<8x8xf32> to vector<8x8xbf16>
      %c0_123 = arith.constant 0 : index
      %c0_124 = arith.constant 0 : index
      %c0_125 = arith.constant 0 : index
      %192 = vector.load %arg7[%c0_123, %c0_124, %c0_125] : memref<1x8x32xbf16, #tpu.memory_space<vmem>>, vector<1x8x8xbf16>
      %193 = vector.shape_cast %192 : vector<1x8x8xbf16> to vector<8x8xbf16>
      %194 = vector.shape_cast %191 : vector<8x8xbf16> to vector<1x8x8xbf16>
      tpu.vector_store %arg7[%c0_123, %c0_124, %c0_125], %194 {strides = array<i32>} : memref<1x8x32xbf16, #tpu.memory_space<vmem>>, vector<1x8x8xbf16>,
      %c1_126 = arith.constant 1 : index
      %c0_127 = arith.constant 0 : index
      %c0_128 = arith.constant 0 : index
      %195 = vector.load %arg9[%c1_126, %c0_127, %c0_128] : memref<4x8x128xf32, #tpu.memory_space<vmem>>, vector<1x8x128xf32>
      %196 = vector.shape_cast %195 : vector<1x8x128xf32> to vector<8x128xf32>
      %197 = vector.extract_strided_slice %196 {offsets = [0, 0], sizes = [8, 1], strides = [1, 1]} : vector<8x128xf32> to vector<8x1xf32>
      %198 = tpu.reciprocal %197 {approx = true} : vector<8x1xf32> -> vector<8x1xf32>
      %c0_129 = arith.constant 0 : index
      %c8_130 = arith.constant 8 : index
      %199 = vector.load %arg10[%c0_129, %c8_130] : memref<8x32xf32, #tpu.memory_space<vmem>>, vector<8x8xf32>
      %200 = vector.broadcast %198 : vector<8x1xf32> to vector<8x8xf32>
      %201 = arith.mulf %199, %200 : vector<8x8xf32>
      %202 = arith.truncf %201 : vector<8x8xf32> to vector<8x8xbf16>
      %c0_131 = arith.constant 0 : index
      %c0_132 = arith.constant 0 : index
      %c8_133 = arith.constant 8 : index
      %203 = vector.load %arg7[%c0_131, %c0_132, %c8_133] : memref<1x8x32xbf16, #tpu.memory_space<vmem>>, vector<1x8x8xbf16>
      %204 = vector.shape_cast %203 : vector<1x8x8xbf16> to vector<8x8xbf16>
      %205 = vector.shape_cast %202 : vector<8x8xbf16> to vector<1x8x8xbf16>
      tpu.vector_store %arg7[%c0_131, %c0_132, %c8_133], %205 {strides = array<i32>} : memref<1x8x32xbf16, #tpu.memory_space<vmem>>, vector<1x8x8xbf16>,
      %c2_134 = arith.constant 2 : index
      %c0_135 = arith.constant 0 : index
      %c0_136 = arith.constant 0 : index
      %206 = vector.load %arg9[%c2_134, %c0_135, %c0_136] : memref<4x8x128xf32, #tpu.memory_space<vmem>>, vector<1x8x128xf32>
      %207 = vector.shape_cast %206 : vector<1x8x128xf32> to vector<8x128xf32>
      %208 = vector.extract_strided_slice %207 {offsets = [0, 0], sizes = [8, 1], strides = [1, 1]} : vector<8x128xf32> to vector<8x1xf32>
      %209 = tpu.reciprocal %208 {approx = true} : vector<8x1xf32> -> vector<8x1xf32>
      %c0_137 = arith.constant 0 : index
      %c16_138 = arith.constant 16 : index
      %210 = vector.load %arg10[%c0_137, %c16_138] : memref<8x32xf32, #tpu.memory_space<vmem>>, vector<8x8xf32>
      %211 = vector.broadcast %209 : vector<8x1xf32> to vector<8x8xf32>
      %212 = arith.mulf %210, %211 : vector<8x8xf32>
      %213 = arith.truncf %212 : vector<8x8xf32> to vector<8x8xbf16>
      %c0_139 = arith.constant 0 : index
      %c0_140 = arith.constant 0 : index
      %c16_141 = arith.constant 16 : index
      %214 = vector.load %arg7[%c0_139, %c0_140, %c16_141] : memref<1x8x32xbf16, #tpu.memory_space<vmem>>, vector<1x8x8xbf16>
      %215 = vector.shape_cast %214 : vector<1x8x8xbf16> to vector<8x8xbf16>
      %216 = vector.shape_cast %213 : vector<8x8xbf16> to vector<1x8x8xbf16>
      tpu.vector_store %arg7[%c0_139, %c0_140, %c16_141], %216 {strides = array<i32>} : memref<1x8x32xbf16, #tpu.memory_space<vmem>>, vector<1x8x8xbf16>,
      %c3_142 = arith.constant 3 : index
      %c0_143 = arith.constant 0 : index
      %c0_144 = arith.constant 0 : index
      %217 = vector.load %arg9[%c3_142, %c0_143, %c0_144] : memref<4x8x128xf32, #tpu.memory_space<vmem>>, vector<1x8x128xf32>
      %218 = vector.shape_cast %217 : vector<1x8x128xf32> to vector<8x128xf32>
      %219 = vector.extract_strided_slice %218 {offsets = [0, 0], sizes = [8, 1], strides = [1, 1]} : vector<8x128xf32> to vector<8x1xf32>
      %220 = tpu.reciprocal %219 {approx = true} : vector<8x1xf32> -> vector<8x1xf32>
      %c0_145 = arith.constant 0 : index
      %c24_146 = arith.constant 24 : index
      %221 = vector.load %arg10[%c0_145, %c24_146] : memref<8x32xf32, #tpu.memory_space<vmem>>, vector<8x8xf32>
      %222 = vector.broadcast %220 : vector<8x1xf32> to vector<8x8xf32>
      %223 = arith.mulf %221, %222 : vector<8x8xf32>
      %224 = arith.truncf %223 : vector<8x8xf32> to vector<8x8xbf16>
      %c0_147 = arith.constant 0 : index
      %c0_148 = arith.constant 0 : index
      %c24_149 = arith.constant 24 : index
      %225 = vector.load %arg7[%c0_147, %c0_148, %c24_149] : memref<1x8x32xbf16, #tpu.memory_space<vmem>>, vector<1x8x8xbf16>
      %226 = vector.shape_cast %225 : vector<1x8x8xbf16> to vector<8x8xbf16>
      %227 = vector.shape_cast %224 : vector<8x8xbf16> to vector<1x8x8xbf16>
      tpu.vector_store %arg7[%c0_147, %c0_148, %c24_149], %227 {strides = array<i32>} : memref<1x8x32xbf16, #tpu.memory_space<vmem>>, vector<1x8x8xbf16>,
    } else {
    }
    return
  }
  func.func @transform_0(%arg0: i32, %arg1: i32, %arg2: i32) -> (i32, i32, i32) {
    %c0_i32 = arith.constant 0 : i32
    %c0_i32_0 = arith.constant 0 : i32
    return %arg0, %arg1, %c0_i32 : i32, i32, i32
  }
  func.func @transform_1(%arg0: i32, %arg1: i32, %arg2: i32) -> (i32, i32, i32) {
    %c0_i32 = arith.constant 0 : i32
    %c0_i32_0 = arith.constant 0 : i32
    return %arg0, %arg2, %c0_i32 : i32, i32, i32
  }
  func.func @transform_2(%arg0: i32, %arg1: i32, %arg2: i32) -> (i32, i32, i32) {
    %c0_i32 = arith.constant 0 : i32
    %c0_i32_0 = arith.constant 0 : i32
    return %arg0, %arg2, %c0_i32 : i32, i32, i32
  }
  func.func @transform_3(%arg0: i32, %arg1: i32, %arg2: i32) -> (i32, i32, i32) {
    %c0_i32 = arith.constant 0 : i32
    %c0_i32_0 = arith.constant 0 : i32
    return %arg0, %c0_i32, %arg2 : i32, i32, i32
  }
  func.func @transform_4(%arg0: i32, %arg1: i32, %arg2: i32) -> (i32, i32, i32) {
    %c0_i32 = arith.constant 0 : i32
    %c0_i32_0 = arith.constant 0 : i32
    return %arg0, %arg1, %c0_i32 : i32, i32, i32
  }
}

</mosaic_0001>

<bundles_post_ra>
// kernel: attention_component_forward.3
= control target key start
LH: loop header
LB: loop body
LE: loop exit
PB: predicated region body
PF: predicated region fallthrough
CT: control target
= control target key end

     0   :  { %v130_v0 = vmov 0.0   ;;  %vm131_vm0 = vmmov 0   ;;  %vm45_vm1 = vcmask 261120   ;;  %vm98_vm2 = vcmask 781312   ;;  %s170_s1 = inlined_call_operand.vmem [shape: bf16[32,96], index: 1, kind: input, shape index: {}]   ;;  %s171_s0 = inlined_call_operand.vmem [shape: bf16[16,32], index: 0, kind: input, shape index: {}]   ;;  %s172_s2 = inlined_call_operand.vmem [shape: f32[1,96], index: 2, kind: input, shape index: {}]   ;;  %s173_s3 = inlined_call_operand.vmem [shape: bf16[16,96], index: 3, kind: output, shape index: {}]  }
   0x1   :  { %117 = vmatprep.subr.bf16.mxu0 %v130_v0  ;;  %v127_v1 = vld [vmem:[%s170_s1] sm:$0xff]   ;;  %121 = vmatprep.mubr.msk.bf16.mxu0 %vm131_vm0, %v130_v0  ;;  %v128_v2 = vld [vmem:[%s170_s1 + $0x8] sm:$0xff]  }
   0x2   :  { %118 = vmatpush3.bf16.msra.mxu0 %v127_v1  ;;  %v129_v3 = vld [vmem:[%s171_s0] sm:$0xff]  }
   0x3   :  { %119 = vmatprep.subr.bf16.mxu0 %v130_v0  ;;  %v105_v4 = vld [vmem:[%s172_s2] ss:$0 sm:$0xff] }
   0x6   :  { %120 = vmatpush3.bf16.msra.mxu0 %v128_v2 }
   0x9   :  { %122 = vmatmul.mubr.msk.bf16.vlgmr.msra.gmra.mrb[0].mxu0 %vm45_vm1, %v129_v3 }
  0xdc   :  { %v83_v5 = vpop.f32.mrb[0].mxu0 }
  0xdd   :  { %v84_v6 = vadd.f32 %v105_v4, %v83_v5  ;;  %v123_v7 = vpop.f32.mrb[1].mxu0 }
  0xde   :  { %v86_v8 = vpop.f32.mrb[2].mxu0 }
  0xdf   :  { %v112_v9 = vpack.c.bf16 %v84_v6, %v84_v6  ;;  %v87_v10 = vadd.f32 %v105_v4, %v86_v8  ;;  %v124_v11 = vpop.f32.mrb[3].mxu0 }
  0xe1   :  { %99 = vst.msk [vmem:[%s173_s3] sm:$0xf] %vm98_vm2, %v112_v9  ;;  %v113_v12 = vpack.c.bf16 %v87_v10, %v87_v10 }
  0xe3   :  { %100 = vst.msk [vmem:[%s173_s3 + $0x4] sm:$0xf] %vm98_vm2, %v113_v12 }

// kernel: attention_component_forward.5
= control target key start
LH: loop header
LB: loop body
LE: loop exit
PB: predicated region body
PF: predicated region fallthrough
CT: control target
= control target key end

     0   :  { %v117_v0 = vmov 0.0   ;;  %vm118_vm0 = vmmov 0   ;;  %vm45_vm1 = vcmask 261120   ;;  %s157_s1 = inlined_call_operand.vmem [shape: bf16[32,32], index: 1, kind: input, shape index: {}]   ;;  %s158_s0 = inlined_call_operand.vmem [shape: bf16[16,32], index: 0, kind: input, shape index: {}]   ;;  %s159_s2 = inlined_call_operand.vmem [shape: f32[1,32], index: 2, kind: input, shape index: {}]   ;;  %s160_s3 = inlined_call_operand.vmem [shape: f32[16,32], index: 3, kind: output, shape index: {}]  }
   0x1   :  { %104 = vmatprep.subr.bf16.mxu0 %v117_v0  ;;  %v114_v1 = vld [vmem:[%s157_s1] sm:$0xff]   ;;  %108 = vmatprep.mubr.msk.bf16.mxu0 %vm118_vm0, %v117_v0  ;;  %v115_v2 = vld [vmem:[%s157_s1 + $0x8] sm:$0xff]  }
   0x2   :  { %105 = vmatpush3.bf16.msra.mxu0 %v114_v1  ;;  %v116_v3 = vld [vmem:[%s158_s0] sm:$0xff]  }
   0x3   :  { %106 = vmatprep.subr.bf16.mxu0 %v117_v0  ;;  %v96_v4 = vld [vmem:[%s159_s2] ss:$0 sm:$0xff] }
   0x6   :  { %107 = vmatpush3.bf16.msra.mxu0 %v115_v2 }
   0x9   :  { %109 = vmatmul.mubr.msk.bf16.vlgmr.msra.gmra.mrb[0].mxu0 %vm45_vm1, %v116_v3 }
  0xdc   :  { %v83_v5 = vpop.f32.mrb[0].mxu0 }
  0xdd   :  { %v84_v6 = vadd.f32 %v96_v4, %v83_v5  ;;  %v110_v7 = vpop.f32.mrb[1].mxu0 }
  0xde   :  { %v86_v8 = vpop.f32.mrb[2].mxu0 }
  0xdf   :  { %90 = vst.msk [vmem:[%s160_s3] sm:$0xff] %vm45_vm1, %v84_v6  ;;  %v87_v9 = vadd.f32 %v96_v4, %v86_v8  ;;  %v111_v10 = vpop.f32.mrb[3].mxu0 }
  0xe1   :  { %91 = vst.msk [vmem:[%s160_s3 + $0x8] sm:$0xff] %vm45_vm1, %v87_v9 }

// kernel: attention_component_forward.4
= control target key start
LH: loop header
LB: loop body
LE: loop exit
PB: predicated region body
PF: predicated region fallthrough
CT: control target
= control target key end

     0   :  { %s1309_s15 = smov 0   ;;  %s1311_s16 = smov 0   ;;  %s1460_s0 = inlined_call_operand.vmem [shape: bf16[2,8,32], index: 0, kind: input, shape index: {}]   ;;  %s1461_s1 = inlined_call_operand.vmem [shape: bf16[2,8,32], index: 1, kind: input, shape index: {}]   ;;  %s1462_s2 = inlined_call_operand.vmem [shape: bf16[2,8,32], index: 2, kind: input, shape index: {}]   ;;  %s1463_s3 = inlined_call_operand.vmem [shape: f32[2,1,8], index: 3, kind: input, shape index: {}]   ;;  %s1464_s4 = inlined_call_operand.vmem [shape: bf16[2,8,32], index: 4, kind: output, shape index: {}]  }
   0x1   :  { %s1313_s17 = smov 0  }
   0x2 LB: > { %s33_s18 = sadd.s32 1, %s1269_s16  ;;  %p1097_p0 = scmp.ge.s32.totalorder %s1273_s17, 1  ;;  %s1273_s17 = sphi %s1313_s17, %s14_s17   ;;  %s1269_s16 = sphi %s1311_s16, %s1466_s16   ;;  %s1265_s15 = sphi %s1309_s15, %s1465_s15  }
   0x3   : > { %p35_p1 = scmp.ge.s32.totalorder %s33_s18, 2  ;;  %p228_p2 = scmp.lt.s32.totalorder %s1273_s17, 3 }
   0x5   : > { %s1468_s18 = smov (%p35_p1, %s33_s18), 0  ;;  %p229_p3 = pnand %p1097_p0, %p228_p2 }
   0x6   : > { %p278_p4 = scmp.lt.s32.totalorder (!%p229_p3), %s1265_s15, 1  ;;  %v1275_v0 = vmov (!%p229_p3), 0.0   ;;  %vm1276_vm0 = vmmov (!%p229_p3), 0   ;;  %vm339_vm1 = vcmask (!%p229_p3), 64512   ;;  %v1277_v5 = vmov (!%p229_p3), 0   ;;  %s1278_s29 = smov (!%p229_p3), 120  }
   0x7   : > { %232 = sbr.rel (%p229_p3) target bundleno = 1412 (0x584), region = 36  ;;  %1138 = vmatprep.subr.bf16.mxu0 (!%p229_p3), %v1275_v0  ;;  %1140 = vmatprep.mubr.msk.bf16.mxu0 (!%p229_p3), %vm1276_vm0, %v1275_v0  ;;  %s1279_s30 = smov (!%p229_p3), 112   ;;  %vm412_vm2 = vcmask (!%p229_p3), 1043456   ;;  %vm326_vm3 = vcmask (!%p229_p3), 261120   ;;  %vm615_vm4 = vcmask (!%p229_p3), 130112   ;;  %vm767_vm5 = vcmask (!%p229_p3), 195712  }
   0x8   : > { %1144 = vmatprep.subr.bf16.mxu1 (!%p229_p3), %v1275_v0  ;;  %1146 = vmatprep.mubr.msk.bf16.mxu1 (!%p229_p3), %vm1276_vm0, %v1275_v0  ;;  %s1280_s5 = smov (!%p229_p3), 104   ;;  %327 = vst.msk [vmem:[#allocation4] sm:$0xff] (!%p229_p3), %vm326_vm3, %v1275_v0  ;;  %s1281_s9 = smov (!%p229_p3), 8   ;;  %vm919_vm6 = vcmask (!%p229_p3), 261312   ;;  %vm936_vm7 = vcmask (!%p229_p3), 60416   ;;  %vm948_vm8 = vcmask (!%p229_p3), 126016  }
   0x9   : > { %1219 = vset.pattern.permute.xlu0 (!%p229_p3), %v1277_v5  ;;  %1220 = vset.pattern.permute.xlu1 (!%p229_p3), %v1277_v5  ;;  %s1282_s10 = smov (!%p229_p3), 16   ;;  %s1283_s11 = smov (!%p229_p3), 24   ;;  %vm960_vm9 = vcmask (!%p229_p3), 191616   ;;  %vm972_vm10 = vcmask (!%p229_p3), 257216  }
   0xe   : > { %s1470_s15 = smov (!%p278_p4, %s1265_s15), 1 }
   0xf   : > { %s1333_s19 = sshll.u32 %s1470_s15, 2  ;;  %s304_s28 = scalar_lea.vmem %s1463_s3, %s1470_s15 }
  0x10   : > { %s1339_s22 = scalar_lea.vmem %s1461_s1, %s1333_s19  ;;  %s1345_s25 = scalar_lea.vmem %s1460_s0, %s1333_s19  ;;  %v1357_v6 = vld [vmem:[%s304_s28] ss:$0 sm:$0xff] }
  0x11   : > { %v331_v1 = vld [vmem:[%s1339_s22] sm:$0xf]  ;;  %s1377_s8 = scalar_lea.vmem %s1462_s2, %s1333_s19  ;;  %s311_s14 = scalar_lea.vmem %s1464_s4, %s1333_s19 }
  0x12   : > { %v344_v2 = vsel %vm339_vm1, %v331_v1, 0  ;;  %v329_v3 = vld [vmem:[%s1345_s25] sm:$0xf] }
  0x13   : > { %1139 = vmatpush3.bf16.xpose.msra.mxu0 %v344_v2  ;;  %v330_v4 = vmul.bf16 1052065461, %v329_v3  ;;  %v1221_v13 = vld [vmem:[%s1339_s22] ss:$0 sps:$4 sm:$0xff]  }
  0x14   : > { %1156 = vmatprep.subr.bf16.mxu0 %v1275_v0  ;;  %v467_v14 = vld [vmem:[%s1345_s25] sm:$0xf]  ;;  %479 = vrot.lane.b32.xlu1 %v1221_v13, %s1278_s29 }
  0x15   : > { %v468_v15 = vmul.bf16 1052065461, %v467_v14  ;;  %v619_v17 = vld [vmem:[%s1345_s25] sm:$0xf] }
  0x16   : > { %v1222_v18 = vld [vmem:[%s1339_s22] ss:$0 sps:$4 sm:$0xff]   ;;  %v620_v19 = vmul.bf16 1052065461, %v619_v17 }
  0x17   : > { %v1105_v16 = vcombine.low %v468_v15, %v468_v15  ;;  %v771_v21 = vld [vmem:[%s1345_s25] sm:$0xf] }
  0x18   : > { %v1110_v20 = vcombine.low %v620_v19, %v620_v19  ;;  %v1223_v22 = vld [vmem:[%s1339_s22] ss:$0 sps:$4 sm:$0xff]   ;;  %v772_v23 = vmul.bf16 1052065461, %v771_v21 }
  0x19   : > { %474 = vrot.lane.b32.xlu1 %v1105_v16, %s1278_s29  ;;  %v332_v26 = vld [vmem:[%s1377_s8] sm:$0xf] }
  0x1a   : > { %1141 = vmatmul.mubr.msk.bf16.vlgmr.msra.gmra.mrb[0].mxu0 %vm339_vm1, %v330_v4  ;;  %v1115_v24 = vcombine.low %v772_v23, %v772_v23  ;;  %v414_v27 = vsel %vm412_vm2, %v332_v26, 0  ;;  %v1224_v4 = vld [vmem:[%s1377_s8] ss:$0 sps:$4 sm:$0xff]  }
  0x1b   : > { %1158 = vmatprep.mubr.msk.bf16.mxu0 %vm1276_vm0, %v1275_v0  ;;  %1145 = vmatpush3.bf16.msra.mxu1 %v414_v27 }
  0x1c   : > { %1150 = vmatprep.subr.bf16.mxu1 %v1275_v0 }
  0x1d   : > { %631 = vrot.lane.b32.xlu1 %v1222_v18, %s1279_s30 }
  0x21   : > { %626 = vrot.lane.b32.xlu1 %v1110_v20, %s1279_s30 }
  0x25   : > { %783 = vrot.lane.b32.xlu1 %v1223_v22, %s1280_s5 }
  0x29   : > { %778 = vrot.lane.b32.xlu1 %v1115_v24, %s1280_s5  ;;  %v456_v24 = vld [vmem:[#allocation4] sm:$0xff] }
  0x86   : > { %v480_v31 = vpop.permute.xlu1 %479 }
  0x87   : > { %v485_v34 = vsel %vm339_vm1, %v480_v31, 0 }
  0x8b   : > { %v475_v32 = vpop.permute.xlu1 %474 }
  0x8f   : > { %v632_v36 = vpop.permute.xlu1 %631 }
  0x90   : > { %v637_v38 = vsel %vm339_vm1, %v632_v36, 0 }
  0x93   : > { %v627_v37 = vpop.permute.xlu1 %626 }
  0x97   : > { %v784_v39 = vpop.permute.xlu1 %783 }
  0x98   : > { %v789_v40 = vsel %vm339_vm1, %v784_v39, 0 }
  0x9b   : > { %v779_v41 = vpop.permute.xlu1 %778 }
  0xed   : > { %v380_v7 = vpop.f32.mrb[0].mxu0 }
  0xee   : > { %v381_v8 = vadd.f32 %v1357_v6, %v380_v7  ;;  %v1142_v9 = vpop.f32.mrb[1].mxu0 }
  0xef   : > { %v383_v10 = vpop.f32.mrb[2].mxu0  ;;  %v1226_v9 = vld [vmem:[%s1377_s8] ss:$0 sps:$4 sm:$0xff]  }
  0xf0   : > { %v1143_v11 = vpop.f32.mrb[3].mxu0  ;;  %v388_v12 = vsel %vm339_vm1, %v381_v8, -inf }
  0xf1   : > { %389 = vmax.xlane.f32.xlu0 %v388_v12 }
 0x17e   : > { %v390_v25 = vpop.xlane.xlu0 %389 }
 0x17f   : > { %397 = vperm.xlu0 %1219, %v390_v25   ;;  %v392_v1 = vsub.f32 -inf, %v390_v25 }
 0x181   : > { %v393_v2 = vmul.f32 1.442695, %v392_v1 }
 0x1fe   : > { %v398_v28 = vpop.permute.xlu0 %397 }
 0x1ff   : > { %v400_v29 = vsub.f32 %v381_v8, %v398_v28  ;;  %v1225_v8 = vld [vmem:[%s1377_s8] ss:$0 sps:$4 sm:$0xff]  }
 0x201   : > { %v401_v30 = vmul.f32 1.442695, %v400_v29 }
 0x203   : > { %1227 = vpow2.f32 %v401_v30 }
 0x204   : > { %1229 = vpow2.f32 %v393_v2 }
 0x20d   : > { %v1382_v33 = vpop.eup %1227 }
 0x20e   : > { %v408_v35 = vpack.c.bf16 %v1382_v33, %v1382_v33  ;;  %v404_v11 = vsel %vm339_vm1, %v1382_v33, 0.0 }
 0x210   : > { %1147 = vmatmul.mubr.msk.bf16.vlgmr.msra.gmra.mrb[0].mxu1 %vm339_vm1, %v408_v35 }
 0x211   : > { %1151 = vmatpush3.bf16.xpose.msra.mxu1 %v485_v34  ;;  %1152 = vmatprep.mubr.msk.bf16.mxu1 %vm1276_vm0, %v1275_v0 }
 0x212   : > { %1162 = vmatprep.subr.bf16.mxu1 %v1275_v0 }
 0x218   : > { %1153 = vmatmul.mubr.msk.bf16.vlgmr.msra.gmra.mrb[4].mxu1 %vm339_vm1, %v475_v32 }
 0x219   : > { %1163 = vmatpush3.bf16.xpose.msra.mxu1 %v637_v38  ;;  %1164 = vmatprep.mubr.msk.bf16.mxu1 %vm1276_vm0, %v1275_v0 }
 0x21a   : > { %1174 = vmatprep.subr.bf16.mxu1 %v1275_v0 }
 0x220   : > { %1165 = vmatmul.mubr.msk.bf16.vlgmr.msra.gmra.mrb[8].mxu1 %vm339_vm1, %v627_v37 }
 0x221   : > { %1175 = vmatpush3.bf16.xpose.msra.mxu1 %v789_v40  ;;  %1176 = vmatprep.mubr.msk.bf16.mxu1 %vm1276_vm0, %v1275_v0 }
 0x228   : > { %1177 = vmatmul.mubr.msk.bf16.vlgmr.msra.gmra.mrb[12].mxu1 %vm339_vm1, %v779_v41 }
 0x2e3   : > { %v1401_v42 = vpop.f32.mrb[0].mxu1 }
 0x2e4   : > { %v1148_v43 = vpop.f32.mrb[1].mxu1 }
 0x2e5   : > { %v453_v44 = vpop.f32.mrb[2].mxu1 }
 0x2e6   : > { %v1149_v45 = vpop.f32.mrb[3].mxu1 }
 0x2eb   : > { %v521_v46 = vpop.f32.mrb[4].mxu1 }
 0x2ec   : > { %v522_v47 = vadd.f32 %v1357_v6, %v521_v46  ;;  %v1154_v48 = vpop.f32.mrb[5].mxu1 }
 0x2ed   : > { %v524_v49 = vpop.f32.mrb[6].mxu1 }
 0x2ee   : > { %v1155_v50 = vpop.f32.mrb[7].mxu1  ;;  %v531_v51 = vsel %vm339_vm1, %v522_v47, -inf }
 0x2ef   : > { %532 = vmax.xlane.f32.xlu1 %v531_v51 }
 0x2f3   : > { %v673_v52 = vpop.f32.mrb[8].mxu1 }
 0x2f4   : > { %v674_v53 = vadd.f32 %v1357_v6, %v673_v52  ;;  %v1166_v54 = vpop.f32.mrb[9].mxu1 }
 0x2f5   : > { %v676_v55 = vpop.f32.mrb[10].mxu1 }
 0x2f6   : > { %v1167_v56 = vpop.f32.mrb[11].mxu1  ;;  %v683_v57 = vsel %vm339_vm1, %v674_v53, -inf }
 0x2f7   : > { %684 = vmax.xlane.f32.xlu0 %v683_v57 }
 0x2fb   : > { %v825_v58 = vpop.f32.mrb[12].mxu1 }
 0x2fc   : > { %v826_v59 = vadd.f32 %v1357_v6, %v825_v58  ;;  %v1178_v60 = vpop.f32.mrb[13].mxu1  ;;  %v1412_v6 = vpop.eup %1229 }
 0x2fd   : > { %v828_v61 = vpop.f32.mrb[14].mxu1  ;;  %v403_v48 = vmul.f32 0.0, %v1412_v6 }
 0x2fe   : > { %v1179_v62 = vpop.f32.mrb[15].mxu1  ;;  %v835_v63 = vsel %vm339_vm1, %v826_v59, -inf }
 0x2ff   : > { %836 = vmax.xlane.f32.xlu1 %v835_v63 }
 0x37c   : > { %v533_v3 = vpop.xlane.xlu1 %532 }
 0x37d   : > { %540 = vperm.xlu1 %1220, %v533_v3   ;;  %v535_v10 = vsub.f32 -inf, %v533_v3 }
 0x37f   : > { %v536_v12 = vmul.f32 1.442695, %v535_v10 }
 0x381   : > { %555 = vrot.lane.b32.xlu1 %v1224_v4, %s1278_s29  ;;  %1231 = vpow2.f32 %v536_v12 }
 0x384   : > { %v685_v5 = vpop.xlane.xlu0 %684 }
 0x385   : > { %692 = vperm.xlu0 %1219, %v685_v5   ;;  %v687_v13 = vsub.f32 -inf, %v685_v5 }
 0x387   : > { %v688_v14 = vmul.f32 1.442695, %v687_v13 }
 0x389   : > { %459 = vperm.xlu0 %1219, %v1412_v6   ;;  %1233 = vpow2.f32 %v688_v14 }
 0x38b   : > { %v1424_v15 = vpop.eup %1231 }
 0x38c   : > { %v1415_v7 = vpop.xlane.xlu1 %836  ;;  %v546_v58 = vmul.f32 0.0, %v1424_v15 }
 0x38d   : > { %844 = vperm.xlu1 %1220, %v1415_v7   ;;  %v839_v45 = vsub.f32 -inf, %v1415_v7 }
 0x38f   : > { %v840_v50 = vmul.f32 1.442695, %v839_v45 }
 0x391   : > { %707 = vrot.lane.b32.xlu1 %v1225_v8, %s1279_s30 }
 0x393   : > { %v1234_v16 = vpop.eup %1233 }
 0x394   : > { %v698_v52 = vmul.f32 0.0, %v1234_v16 }
 0x395   : > { %859 = vrot.lane.b32.xlu1 %v1226_v9, %s1280_s5 }
 0x3b9   : > { %405 = vadd.xlane.f32.xlu1 %v404_v11 }
 0x3ca   : > { %606 = vperm.xlu1 %1220, %v1424_v15  }
 0x3ce   : > { %758 = vperm.xlu1 %1220, %v1234_v16  }
 0x3fc   : > { %v541_v17 = vpop.permute.xlu1 %540 }
 0x3fd   : > { %v543_v18 = vsub.f32 %v522_v47, %v541_v17 }
 0x3ff   : > { %v544_v19 = vmul.f32 1.442695, %v543_v18 }
 0x400   : > { %v556_v20 = vpop.permute.xlu1 %555 }
 0x401   : > { %1235 = vpow2.f32 %v544_v19  ;;  %v561_v21 = vsel %vm412_vm2, %v556_v20, 0 }
 0x402   : > { %1157 = vmatpush3.bf16.msra.mxu0 %v561_v21 }
 0x403   : > { %1168 = vmatprep.subr.bf16.mxu0 %v1275_v0 }
 0x404   : > { %v693_v22 = vpop.permute.xlu0 %692 }
 0x405   : > { %v695_v23 = vsub.f32 %v674_v53, %v693_v22 }
 0x407   : > { %v696_v25 = vmul.f32 1.442695, %v695_v23 }
 0x408   : > { %v460_v26 = vpop.permute.xlu0 %459 }
 0x409   : > { %1237 = vpow2.f32 %v696_v25  ;;  %v462_v27 = vmul.f32 %v460_v26, %v456_v24 }
 0x40b   : > { %v1236_v28 = vpop.eup %1235  ;;  %v463_v29 = vadd.f32 %v462_v27, %v1401_v42 }
 0x40c   : > { %v845_v30 = vpop.permute.xlu1 %844  ;;  %v547_v31 = vsel %vm339_vm1, %v1236_v28, 0.0  ;;  %v551_v32 = vpack.c.bf16 %v1236_v28, %v1236_v28 }
 0x40d   : > { %464 = vst.msk [vmem:[#allocation4] sm:$0xff] %vm339_vm1, %v463_v29  ;;  %v847_v33 = vsub.f32 %v826_v59, %v845_v30  ;;  %548 = vadd.xlane.f32.xlu0 %v547_v31 }
 0x40e   : > { %1159 = vmatmul.mubr.msk.bf16.vlgmr.msra.gmra.mrb[4].mxu0 %vm339_vm1, %v551_v32 }
 0x40f   : > { %v848_v34 = vmul.f32 1.442695, %v847_v33  ;;  %1170 = vmatprep.mubr.msk.bf16.mxu0 %vm1276_vm0, %v1275_v0 }
 0x410   : > { %v708_v35 = vpop.permute.xlu1 %707 }
 0x411   : > { %1239 = vpow2.f32 %v848_v34  ;;  %v713_v36 = vsel %vm412_vm2, %v708_v35, 0 }
 0x412   : > { %1169 = vmatpush3.bf16.msra.mxu0 %v713_v36 }
 0x413   : > { %v1238_v37 = vpop.eup %1237  ;;  %1180 = vmatprep.subr.bf16.mxu0 %v1275_v0 }
 0x414   : > { %v699_v38 = vsel %vm339_vm1, %v1238_v37, 0.0  ;;  %v703_v39 = vpack.c.bf16 %v1238_v37, %v1238_v37  ;;  %v860_v40 = vpop.permute.xlu1 %859  ;;  %v603_v13 = vld [vmem:[#allocation4] sm:$0xff] }
 0x415   : > { %700 = vadd.xlane.f32.xlu0 %v699_v38  ;;  %v865_v41 = vsel %vm412_vm2, %v860_v40, 0 }
 0x416   : > { %1171 = vmatmul.mubr.msk.bf16.vlgmr.msra.gmra.mrb[8].mxu0 %vm339_vm1, %v703_v39 }
 0x417   : > { %1181 = vmatpush3.bf16.msra.mxu0 %v865_v41  ;;  %1182 = vmatprep.mubr.msk.bf16.mxu0 %vm1276_vm0, %v1275_v0 }
 0x41b   : > { %v1240_v42 = vpop.eup %1239 }
 0x41c   : > { %v851_v43 = vsel %vm339_vm1, %v1240_v42, 0.0  ;;  %v855_v44 = vpack.c.bf16 %v1240_v42, %v1240_v42 }
 0x41d   : > { %852 = vadd.xlane.f32.xlu0 %v851_v43 }
 0x41e   : > { %1183 = vmatmul.mubr.msk.bf16.vlgmr.msra.gmra.mrb[12].mxu0 %vm339_vm1, %v855_v44 }
 0x446   : > { %v406_v46 = vpop.xlane.xlu1 %405 }
 0x447   : > { %v407_v49 = vadd.f32 %v406_v46, %v403_v48 }
 0x449   : > { %1241 = vrcp.f32 %v407_v49 }
 0x44a   : > { %1243 = vpow2.f32 %v840_v50  ;;  %v607_v12 = vpop.permute.xlu1 %606 }
 0x44b   : > { %v609_v14 = vmul.f32 %v607_v12, %v603_v13 }
 0x44e   : > { %v759_v17 = vpop.permute.xlu1 %758 }
 0x453   : > { %v1242_v57 = vpop.eup %1241 }
 0x454   : > { %v1244_v59 = vpop.eup %1243 }
 0x455   : > { %v850_v63 = vmul.f32 0.0, %v1244_v59 }
 0x49a   : > { %v549_v47 = vpop.xlane.xlu0 %548 }
 0x49b   : > { %v550_v60 = vadd.f32 %v549_v47, %v546_v58 }
 0x4a2   : > { %v701_v51 = vpop.xlane.xlu0 %700 }
 0x4a3   : > { %v702_v53 = vadd.f32 %v701_v51, %v698_v52 }
 0x4a5   : > { %1245 = vrcp.f32 %v702_v53 }
 0x4a6   : > { %1247 = vrcp.f32 %v550_v60 }
 0x4aa   : > { %v853_v61 = vpop.xlane.xlu0 %852 }
 0x4ab   : > { %v854_v3 = vadd.f32 %v853_v61, %v850_v63 }
 0x4ad   : > { %1249 = vrcp.f32 %v854_v3 }
 0x4af   : > { %v1246_v62 = vpop.eup %1245 }
 0x4b0   : > { %v1248_v10 = vpop.eup %1247 }
 0x4b7   : > { %v1250_v11 = vpop.eup %1249 }
 0x4e1   : > { %v597_v0 = vpop.f32.mrb[4].mxu0 }
 0x4e2   : > { %611 = vrot.lane.b32.xlu0 %v597_v0, %s1281_s9  ;;  %v1160_v54 = vpop.f32.mrb[5].mxu0 }
 0x4e3   : > { %v600_v55 = vpop.f32.mrb[6].mxu0 }
 0x4e4   : > { %v1161_v56 = vpop.f32.mrb[7].mxu0 }
 0x4e6   : > { %931 = vperm.xlu0 %1219, %v1242_v57  }
 0x4e9   : > { %v749_v1 = vpop.f32.mrb[8].mxu0 }
 0x4ea   : > { %955 = vperm.xlu0 %1219, %v1246_v62   ;;  %763 = vrot.lane.b32.xlu1 %v749_v1, %s1282_s10  ;;  %v1172_v2 = vpop.f32.mrb[9].mxu0 }
 0x4eb   : > { %v752_v4 = vpop.f32.mrb[10].mxu0 }
 0x4ec   : > { %v1173_v5 = vpop.f32.mrb[11].mxu0 }
 0x4ee   : > { %910 = vperm.xlu1 %1220, %v1244_v59  }
 0x4f1   : > { %v901_v6 = vpop.f32.mrb[12].mxu0 }
 0x4f2   : > { %915 = vrot.lane.b32.xlu1 %v901_v6, %s1283_s11  ;;  %v1184_v7 = vpop.f32.mrb[13].mxu0 }
 0x4f3   : > { %v904_v8 = vpop.f32.mrb[14].mxu0 }
 0x4f4   : > { %v1185_v9 = vpop.f32.mrb[15].mxu0 }
 0x4f6   : > { %943 = vperm.xlu1 %1220, %v1248_v10  }
 0x4fa   : > { %967 = vperm.xlu1 %1220, %v1250_v11  }
 0x554   : > { %v612_v15 = vpop.permute.xlu0 %611 }
 0x555   : > { %v614_v16 = vadd.f32 %v612_v15, %v609_v14 }
 0x557   : > { %616 = vst.msk [vmem:[#allocation4] sm:$0xff] %vm615_vm4, %v614_v16 }
 0x55c   : > { %v764_v20 = vpop.permute.xlu1 %763 }
 0x55e   : > { %v755_v18 = vld [vmem:[#allocation4] sm:$0xff] }
 0x55f   : > { %v761_v19 = vmul.f32 %v759_v17, %v755_v18 }
 0x561   : > { %v766_v21 = vadd.f32 %v764_v20, %v761_v19 }
 0x563   : > { %768 = vst.msk [vmem:[#allocation4] sm:$0xff] %vm767_vm5, %v766_v21 }
 0x565   : > { %v932_v27 = vpop.permute.xlu0 %931 }
 0x569   : > { %v956_v29 = vpop.permute.xlu0 %955 }
 0x56a   : > { %v907_v23 = vld [vmem:[#allocation4] sm:$0xff] }
 0x56d   : > { %v911_v22 = vpop.permute.xlu1 %910 }
 0x56e   : > { %v913_v24 = vmul.f32 %v911_v22, %v907_v23 }
 0x571   : > { %v916_v25 = vpop.permute.xlu1 %915 }
 0x572   : > { %v918_v26 = vadd.f32 %v916_v25, %v913_v24 }
 0x574   : > { %920 = vst.msk [vmem:[#allocation4] sm:$0xff] %vm919_vm6, %v918_v26 }
 0x575   : > { %v944_v28 = vpop.permute.xlu1 %943 }
 0x579   : > { %v968_v34 = vpop.permute.xlu1 %967 }
 0x57b   : > { %v928_v30 = vld [vmem:[#allocation4] sm:$0xff] }
 0x57c   : > { %v934_v31 = vmul.f32 %v932_v27, %v928_v30  ;;  %v946_v32 = vmul.f32 %v944_v28, %v928_v30  ;;  %v958_v33 = vmul.f32 %v956_v29, %v928_v30  ;;  %v970_v35 = vmul.f32 %v968_v34, %v928_v30 }
 0x57e   : > { %v935_v36 = vpack.c.bf16 %v934_v31, %v934_v31  ;;  %v947_v37 = vpack.c.bf16 %v946_v32, %v946_v32  ;;  %v959_v38 = vpack.c.bf16 %v958_v33, %v958_v33  ;;  %v971_v39 = vpack.c.bf16 %v970_v35, %v970_v35 }
 0x580   : > { %937 = vst.msk [vmem:[%s311_s14] sm:$0xf] %vm936_vm7, %v935_v36 }
 0x581   : > { %949 = vst.msk [vmem:[%s311_s14] sm:$0xf] %vm948_vm8, %v947_v37 }
 0x582   : > { %961 = vst.msk [vmem:[%s311_s14] sm:$0xf] %vm960_vm9, %v959_v38 }
 0x583   : > { %973 = vst.msk [vmem:[%s311_s14] sm:$0xf] %vm972_vm10, %v971_v39 }
 0x584 PF: > { %s14_s17 = sadd.s32 1, %s1273_s17   ;;  %s1465_s15 = smov %s1269_s16 }
 0x585   : > { %p11_p5 = scmp.ge.s32.totalorder %s14_s17, 4   ;;  %s1466_s16 = smov %s1468_s18 }
 0x587   :  { %13 = sbr.rel (!%p11_p5) target bundleno = 2 (0x2), region = 89 }

</bundles_post_ra>
